<compile_context>
chip_gen: v5e
topology: v5e:2x2
jax: 0.10.0
libtpu: 0.0.40
codegen_flags: <defaults>
</compile_context>

<pallas_src>
import functools

import jax
import jax.numpy as jnp
from jax.experimental import pallas as pl
from jax.experimental.pallas import tpu as pltpu


def _embed_kernel(x_ref, w_ref, pos_ref, o_ref):
    # x_ref:   (tp, K)    row tile of flattened patches (rows = B*P flattened)
    # w_ref:   (K, Hp)    flattened conv weight, zero-padded to Hp lanes
    # pos_ref: (tp, Hp)   position embeddings (+ folded conv bias), padded
    # o_ref:   (tp, Hp)   lane-dense output tile
    proj = jnp.dot(x_ref[...], w_ref[...],
                   preferred_element_type=jnp.float32)          # MXU, f32 acc
    out = proj + pos_ref[...].astype(jnp.float32)               # f32 VPU add
    o_ref[...] = out.astype(o_ref.dtype)


def _pick_row_tile(P, max_tile=512):
    """Largest divisor of P that is a multiple of 8 and <= max_tile."""
    best = None
    t = 8
    while t <= min(P, max_tile):
        if P % t == 0:
            best = t
        t += 8
    return best


def prepare_embedding_params(conv_w, conv_b, pos_emb, compute_dtype=jnp.float32):
    """One-time parameter prep (NOT in the per-call hot path).

    Returns (w_pad, pos_pad):
      w_pad   : (K, Hp)  flattened conv weight, transposed, zero-padded to Hp
      pos_pad : (P, Hp)  position embeddings + conv bias, zero-padded to Hp
    where K = C*ph*pw and Hp = hidden rounded up to a multiple of 128.
    """
    hidden, C, ph, pw = conv_w.shape
    K = C * ph * pw
    P = pos_emb.shape[1]
    Hp = max(128, ((hidden + 127) // 128) * 128)

    w_flat = conv_w.reshape(hidden, K).T                    # (K, hidden)
    w_pad = jnp.pad(w_flat, ((0, 0), (0, Hp - hidden))).astype(compute_dtype)

    pos_pb = pos_emb.reshape(P, hidden) + conv_b[None, :]   # fold bias once
    pos_pad = jnp.pad(pos_pb, ((0, 0), (0, Hp - hidden))).astype(compute_dtype)
    return w_pad, pos_pad


def embeddings_forward(x, w_pad, pos_pad, *, hidden, patch_size,
                       compute_dtype=jnp.float32, out_dtype=None, row_tile=512):
    """x: (B, C, H, W) NCHW.  Returns (B, n_patches, hidden)."""
    B, C, H, W = x.shape
    ph, pw = patch_size
    assert H % ph == 0 and W % pw == 0, "spatial dims must be multiples of patch_size"
    hp, wp = H // ph, W // pw
    P = hp * wp
    K = C * ph * pw
    Hp = w_pad.shape[1]
    assert w_pad.shape == (K, Hp) and pos_pad.shape == (P, Hp)
    if out_dtype is None:
        out_dtype = x.dtype

    # --- glue: NCHW -> (B*P, K) patch extraction (fused into the kernel's
    # input pipeline via allow_input_fusion=[0], no standalone HBM round trip).
    patches = x.reshape(B, C, hp, ph, wp, pw)
    patches = jnp.transpose(patches, (0, 2, 4, 1, 3, 5)).reshape(B * P, K)
    patches = patches.astype(compute_dtype)

    tp = _pick_row_tile(P, max_tile=row_tile)
    if tp is None:
        # TODO(synk): pad the row dimension when n_patches is not a multiple of 8.
        raise NotImplementedError("n_patches must have a multiple-of-8 divisor")
    n_tiles = (B * P) // tp
    pos_blocks = P // tp   # pos block reused across the batch via index_map

    out = pl.pallas_call(
        _embed_kernel,
        out_shape=jax.ShapeDtypeStruct((B * P, Hp), out_dtype),
        grid_spec=pltpu.PrefetchScalarGridSpec(
            num_scalar_prefetch=0,
            grid=(n_tiles,),
            in_specs=[
                pl.BlockSpec((tp, K), lambda i: (i, 0)),               # patches
                pl.BlockSpec((K, Hp), lambda i: (0, 0)),               # weight (resident)
                pl.BlockSpec((tp, Hp), lambda i: (i % pos_blocks, 0)), # pos+bias
            ],
            out_specs=pl.BlockSpec((tp, Hp), lambda i: (i, 0)),
        ),
        compiler_params=pltpu.CompilerParams(
            dimension_semantics=("parallel",),        # megacore-shardable on v7x
            vmem_limit_bytes=32 * 1024 * 1024,        # explicit, safe on v5e/v6e/v7x
            allow_input_fusion=[0],                   # fuse patch transpose into input DMA
        ),
    )(patches, w_pad, pos_pad)

    # Drop lane padding and restore (B, P, hidden).
    return out[:, :hidden].reshape(B, P, hidden)


def _reference(x, conv_w, conv_b, pos_emb, patch_size):
    """Plain-JAX reference matching the PyTorch forward (eval mode)."""
    y = jax.lax.conv_general_dilated(
        x, conv_w,
        window_strides=patch_size,
        padding="VALID",
        dimension_numbers=("NCHW", "OIHW", "NCHW"),
    )
    y = y + conv_b[None, :, None, None]
    B, Hd, hp, wp = y.shape
    y = y.reshape(B, Hd, hp * wp)            # flatten(2)
    y = jnp.transpose(y, (0, 2, 1))          # transpose(-1, -2)
    return y + pos_emb                       # + position_embeddings (dropout=identity)


if __name__ == "__main__":
    # Small shapes consistent with the module: img 16x16, patch 4x4, C=4, hidden=32.
    B, C = 2, 4
    img_size = (16, 16)
    patch_size = (4, 4)
    hidden = 32
    n_patches = (img_size[0] // patch_size[0]) * (img_size[1] // patch_size[1])

    key = jax.random.PRNGKey(0)
    kx, kw, kb, kp = jax.random.split(key, 4)
    x = jax.random.normal(kx, (B, C, *img_size), dtype=jnp.float32)
    conv_w = jax.random.normal(kw, (hidden, C, *patch_size), dtype=jnp.float32) * 0.05
    conv_b = jax.random.normal(kb, (hidden,), dtype=jnp.float32) * 0.05
    # PyTorch inits position_embeddings to zeros; use a deterministic small random
    # tensor here so the position-add path is actually exercised.
    pos_emb = jax.random.normal(kp, (1, n_patches, hidden), dtype=jnp.float32) * 0.02

    ref = _reference(x, conv_w, conv_b, pos_emb, patch_size)

    # --- f32 path (tight correctness check) ---
    w_pad, pos_pad = prepare_embedding_params(conv_w, conv_b, pos_emb,
                                              compute_dtype=jnp.float32)
    fwd_f32 = jax.jit(functools.partial(
        embeddings_forward, hidden=hidden, patch_size=patch_size,
        compute_dtype=jnp.float32))
    out = jax.block_until_ready(fwd_f32(x, w_pad, pos_pad))
    assert out.shape == (B, n_patches, hidden), out.shape
    assert jnp.allclose(out, ref, atol=1e-4, rtol=1e-4), \
        float(jnp.max(jnp.abs(out - ref)))

    # --- bf16 compute path (mem-bound speedup; f32 MXU accumulation) ---
    w16, pos16 = prepare_embedding_params(conv_w, conv_b, pos_emb,
                                          compute_dtype=jnp.bfloat16)
    fwd_bf16 = jax.jit(functools.partial(
        embeddings_forward, hidden=hidden, patch_size=patch_size,
        compute_dtype=jnp.bfloat16, out_dtype=jnp.float32))
    out16 = jax.block_until_ready(fwd_bf16(x, w16, pos16))
    assert out16.shape == (B, n_patches, hidden), out16.shape
    assert jnp.allclose(out16, ref, atol=5e-2, rtol=5e-2), \
        float(jnp.max(jnp.abs(out16 - ref)))

    print("KERNEL_OK")
</pallas_src>

<mosaic_0001>
module attributes {stable_mosaic.version = 11 : i64} {
  func.func @_embed_kernel(%arg0: i32, %arg1: memref<16x64xf32, #tpu.memory_space<vmem>>, %arg2: memref<64x128xf32, #tpu.memory_space<vmem>>, %arg3: memref<16x128xf32, #tpu.memory_space<vmem>>, %arg4: memref<16x128xf32, #tpu.memory_space<vmem>>) attributes {dimension_semantics = [#tpu.dimension_semantics<parallel>], iteration_bounds = array<i64: 2>, scalar_prefetch = 0 : i64, scratch_operands = 0 : i64, tpu.core_type = #tpu.core_type<tc>, window_params = [{transform_indices = @transform_0, window_bounds = array<i64: 16, 64>}, {pipeline_mode = #tpu.pipeline_mode<synchronous>, transform_indices = @transform_1, window_bounds = array<i64: 64, 128>}, {transform_indices = @transform_2, window_bounds = array<i64: 16, 128>}, {transform_indices = @transform_3, window_bounds = array<i64: 16, 128>}]} {
    %c0 = arith.constant 0 : index
    %c0_0 = arith.constant 0 : index
    %0 = vector.load %arg1[%c0, %c0_0] : memref<16x64xf32, #tpu.memory_space<vmem>>, vector<16x64xf32>
    %c0_1 = arith.constant 0 : index
    %c0_2 = arith.constant 0 : index
    %1 = vector.load %arg2[%c0_1, %c0_2] : memref<64x128xf32, #tpu.memory_space<vmem>>, vector<64x128xf32>
    %cst = arith.constant dense<0.000000e+00> : vector<16x128xf32>
    %2 = tpu.matmul %0, %1, %cst {dimension_numbers = #tpu.dot_dimension_numbers<[1], [0], [0], [1], [0, 0, 1, 1], [], []>} : vector<16x64xf32>, vector<64x128xf32>, vector<16x128xf32> -> vector<16x128xf32>
    %c0_3 = arith.constant 0 : index
    %c0_4 = arith.constant 0 : index
    %3 = vector.load %arg3[%c0_3, %c0_4] : memref<16x128xf32, #tpu.memory_space<vmem>>, vector<16x128xf32>
    %4 = arith.addf %2, %3 : vector<16x128xf32>
    %c0_5 = arith.constant 0 : index
    %c0_6 = arith.constant 0 : index
    %5 = vector.load %arg4[%c0_5, %c0_6] : memref<16x128xf32, #tpu.memory_space<vmem>>, vector<16x128xf32>
    tpu.vector_store %arg4[%c0_5, %c0_6], %4 {strides = array<i32>} : memref<16x128xf32, #tpu.memory_space<vmem>>, vector<16x128xf32>,
    return
  }
  func.func @transform_0(%arg0: i32) -> (i32, i32) {
    %c0_i32 = arith.constant 0 : i32
    %c0_i32_0 = arith.constant 0 : i32
    return %arg0, %c0_i32 : i32, i32
  }
  func.func @transform_1(%arg0: i32) -> (i32, i32) {
    %c0_i32 = arith.constant 0 : i32
    %c0_i32_0 = arith.constant 0 : i32
    %c0_i32_1 = arith.constant 0 : i32
    return %c0_i32, %c0_i32_0 : i32, i32
  }
  func.func @transform_2(%arg0: i32) -> (i32, i32) {
    %c1_i32 = arith.constant 1 : i32
    %c0_i32 = arith.constant 0 : i32
    %0 = arith.cmpi eq, %c1_i32, %c0_i32 : i32
    %c1_i32_0 = arith.constant 1 : i32
    %1 = arith.select %0, %c1_i32_0, %c1_i32 : i32
    %2 = arith.remsi %arg0, %1 : i32
    %c0_i32_1 = arith.constant 0 : i32
    %3 = arith.cmpi ne, %2, %c0_i32_1 : i32
    %c0_i32_2 = arith.constant 0 : i32
    %4 = arith.cmpi slt, %2, %c0_i32_2 : i32
    %c0_i32_3 = arith.constant 0 : i32
    %5 = arith.cmpi slt, %1, %c0_i32_3 : i32
    %6 = arith.xori %4, %5 : i1
    %7 = arith.andi %6, %3 : i1
    %8 = arith.addi %2, %1 : i32
    %9 = arith.select %7, %8, %2 : i32
    %c0_i32_4 = arith.constant 0 : i32
    %c0_i32_5 = arith.constant 0 : i32
    return %9, %c0_i32_4 : i32, i32
  }
  func.func @transform_3(%arg0: i32) -> (i32, i32) {
    %c0_i32 = arith.constant 0 : i32
    %c0_i32_0 = arith.constant 0 : i32
    return %arg0, %c0_i32 : i32, i32
  }
}

</mosaic_0001>

<bundles_post_ra>
// kernel: embeddings_forward.1
= control target key start
LH: loop header
LB: loop body
LE: loop exit
PB: predicated region body
PF: predicated region fallthrough
CT: control target
= control target key end

     0   :  { %8 = vsyncpa [#allocation3], 0  ;;  %s558_s0 = inlined_call_operand.vmem [shape: f32[32,64], index: 0, kind: input, shape index: {}]   ;;  %s559_s1 = inlined_call_operand.vmem [shape: f32[64,128], index: 1, kind: input, shape index: {}]   ;;  %s560_s2 = inlined_call_operand.vmem [shape: f32[16,128], index: 2, kind: input, shape index: {}]   ;;  %s561_s3 = inlined_call_operand.hbm [shape: f32[32,128], index: 3, kind: output, shape index: {}]  }
   0x1   :  { %10 = vsyncpa [#allocation3 + $0x1], 0  ;;  %s444_s12 = smov 0   ;;  %s446_s13 = smov 0  }
   0x2   :  { %s448_s14 = smov 0   ;;  %s450_s15 = smov 0  }
   0x3 LB: > { %s465_s16 = sadd.s32 4294967295, %s420_s15   ;;  %s294_s17 = sadd.s32 4294967294, %s420_s15   ;;  %s420_s15 = sphi %s450_s15, %s567_s15   ;;  %s416_s14 = sphi %s448_s14, %s566_s14   ;;  %s412_s13 = sphi %s446_s13, %s565_s13   ;;  %s408_s12 = sphi %s444_s12, %s564_s12  }
   0x4   : > { %s469_s18 = sadd.s32 1, %s420_s15   ;;  %s91_s19 = sadd.s32 1, %s416_s14 }
   0x5   : > { %s88_s20 = ssub.s32 %s420_s15, %s469_s18  ;;  %p101_p0 = scmp.ne.s32.totalorder %s416_s14, %s412_s13 }
   0x6   : > { %p89_p1 = scmp.eq.s32.totalorder %s88_s20, 0  ;;  %p102_p2 = scmp.eq.s32.totalorder %s465_s16, 1 }
   0x7   : > { %p107_p3 = scmp.ne.s32.totalorder %s412_s13, %s408_s12  ;;  %p108_p4 = scmp.eq.s32.totalorder %s294_s17, 1 }
   0x8   : > { %s480_s21 = scalar_select %p89_p1, %s416_s14, %s91_s19  }
   0x9   : > { %p482_p5 = por %p102_p2, %p101_p0  ;;  %p486_p6 = por %p108_p4, %p107_p3 }
   0xa   : > { %p297_p7 = scmp.ge.s32.totalorder %s420_s15, 1  ;;  %p141_p8 = scmp.lt.s32.totalorder %s420_s15, 3 }
   0xc   : > { %p142_p9 = pnand %p297_p7, %p141_p8 }
   0xd   : > { %s299_s28 = sshll.u32 (!%p142_p9), %s465_s16, 1  ;;  %s162_s27 = sand.u32 (!%p142_p9), 1, %s412_s13  }
   0xe   : > { %145 = sbr.rel (%p142_p9) target bundleno = 168 (0xa8), region = 32  ;;  %p166_p10 = scmp.lt.s32.totalorder (!%p142_p9), %s299_s28, 3 }
   0xf   : > { %s308_s29 = sshll.u32 (!%p142_p9), %s465_s16, 4  ;;  %s217_s16 = scalar_lea.sflag (!%p142_p9), [#allocation3], %s162_s27 }
  0x10   : > { %s228_s5 = scalar_lea.hbm (!%p142_p9), %s561_s3, %s308_s29  ;;  %s378_s26 = scalar_lea.hbm (!%p142_p9), %s561_s3, 32 }
  0x11   : > { %s231_s17 = sshll.u32 (!%p142_p9), %s228_s5, 4  ;;  %s232_s17 = int_to_ptr.hbm [resolvable:$true] %s231_s17 }
  0x12   : > { %s372_s19 = sshra.s32 (!%p142_p9), %s232_s17, 4  ;;  %s373_s19 = int_to_ptr.hbm [resolvable:$true] %s372_s19 }
  0x13   : > { %v181_v0 = vld [vmem:[%s559_s1 + $0x38] sm:$0xff]  ;;  %v180_v1 = vld [vmem:[%s559_s1 + $0x30] sm:$0xff]  ;;  %v179_v2 = vld [vmem:[%s559_s1 + $0x28] sm:$0xff]  ;;  %s569_s28 = smov (!%p166_p10, %s299_s28), 3  ;;  %vm184_vm0 = vcmask 523264   ;;  %s374_s20 = scalar_lea.hbm %s373_s19, 16 }
  0x14   : > { %199 = vmatpush.msra.mxu0 %v181_v0  ;;  %309 = vmatpush.msra.mxu1 %v181_v0  ;;  %v178_v3 = vld [vmem:[%s559_s1 + $0x20] sm:$0xff]  ;;  %v177_v4 = vld [vmem:[%s559_s1 + $0x18] sm:$0xff]  ;;  %s300_s8 = sshll.u32 %s569_s28, 3  ;;  %v176_v5 = vld [vmem:[%s559_s1 + $0x10] sm:$0xff]  ;;  %s298_s28 = sshll.u32 %s162_s27, 4 }
  0x15   : > { %v175_v6 = vld [vmem:[%s559_s1 + $0x8] sm:$0xff]  ;;  %s169_s24 = scalar_lea.vmem %s558_s0, %s300_s8  ;;  %v174_v7 = vld [vmem:[%s559_s1] sm:$0xff]  ;;  %s164_s8 = scalar_lea.vmem [#allocation2], %s298_s28 }
  0x16   : > { %200 = vmatpush.msra.mxu0 %v180_v1  ;;  %310 = vmatpush.msra.mxu1 %v180_v1  ;;  %v172_v8 = vld [vmem:[%s169_s24] sm:$0xff]  ;;  %v173_v9 = vld [vmem:[%s169_s24 + $0x8] sm:$0xff]  ;;  %s229_s9 = sshll.u32 %s164_s8, 4  ;;  %p375_p11 = scmp.ne.s32.totalorder %s373_s19, %s374_s20  ;;  %s230_s9 = int_to_ptr.vmem [resolvable:$true] %s229_s9 }
  0x17   : > { %v182_v10 = vld [vmem:[%s560_s2] sm:$0xff]  ;;  %v183_v11 = vld [vmem:[%s560_s2 + $0x8] sm:$0xff]  ;;  %p379_p0 = scmp.lt.s32.totalorder %s373_s19, %s561_s3  ;;  %p380_p1 = scmp.lt.s32.totalorder %s378_s26, %s374_s20 }
  0x18   : > { %201 = vmatpush.msra.mxu0 %v179_v2  ;;  %311 = vmatpush.msra.mxu1 %v179_v2  ;;  %p376_p12 = pnand %p375_p11, %p482_p5 }
  0x19   : > { %p381_p2 = por %p380_p1, %p379_p0 }
  0x1a   : > { %202 = vmatpush.msra.mxu0 %v178_v3  ;;  %312 = vmatpush.msra.mxu1 %v178_v3  ;;  %p377_p13 = pneg %p376_p12 }
  0x1c   : > { %203 = vmatpush.msra.mxu0 %v177_v4  ;;  %313 = vmatpush.msra.mxu1 %v177_v4  ;;  %p382_p3 = pnand %p381_p2, %p377_p13 }
  0x1e   : > { %204 = vmatpush.msra.mxu0 %v176_v5  ;;  %314 = vmatpush.msra.mxu1 %v176_v5 }
  0x20   : > { %205 = vmatpush.msra.mxu0 %v175_v6  ;;  %315 = vmatpush.msra.mxu1 %v175_v6 }
  0x22   : > { %206 = vmatpush.msra.mxu0 %v174_v7  ;;  %316 = vmatpush.msra.mxu1 %v174_v7 }
  0x23   : > { %301 = vmatmul.msk.f32.vlgmr.msra.gmra.mxu0 %vm184_vm0, %v172_v8  ;;  %302 = vmatmul.msk.f32.vlgmr.msra.gmra.mxu1 %vm184_vm0, %v173_v9 }
  0xa0   : > { %v208_v12 = vpop.f32.mrf.mxu0  ;;  %v211_v13 = vpop.f32.mrf.mxu1 }
  0xa1   : > { %v209_v14 = vadd.f32 %v208_v12, %v182_v10  ;;  %v212_v15 = vadd.f32 %v211_v13, %v183_v11 }
  0xa3   : > { %214 = vst [vmem:[%s164_s8] sm:$0xff] %v209_v14 }
  0xa4   : > { %215 = vst [vmem:[%s164_s8 + $0x8] sm:$0xff] %v212_v15 }
  0xa5   : > { %385 = shalt.err (!%p382_p3)
}
  0xa6   : > { %s422_s27 = smov 128   ;;  %s423_s30 = smov 8  }
  0xa7   : > { %317 = dma.vmem_to_hbm [thread:$0]  (%p482_p5), %s230_s9, 256, %s232_s17, %s217_s16, %s422_s27, %s422_s27, %s423_s30  }
  0xa8 PF: > { %p323_p4 = scmp.ge.s32.totalorder %s420_s15, 2  ;;  %s246_s4 = sand.u32 1, %s408_s12  }
  0xa9   : > { %s247_s5 = scalar_lea.sflag [#allocation3], %s246_s4 }
  0xaa   : > { %p320_p7 = pnand %p323_p4, %p486_p6 }
  0xac   : > { %p321_p8 = pneg %p320_p7 }
  0xae   : > { %403 = dma.done.wait (%p321_p8), %s247_s5, 256  }
  0xaf   : > { %405 = vsyncadd (%p321_p8), %s247_s5, 4294967040  ;;  %p13_p9 = scmp.ge.s32.totalorder %s469_s18, 4   ;;  %s564_s12 = smov %s412_s13 }
  0xb0   : > { %s565_s13 = smov %s416_s14  ;;  %s566_s14 = smov %s480_s21 }
  0xb1   : > { %s567_s15 = smov %s469_s18  ;;  %15 = sbr.rel (!%p13_p9) target bundleno = 3 (0x3), region = 67 }
  0xb6   :  { %253 = vsyncpa [#allocation3], 1 }
  0xb7   :  { %255 = vsyncpa [#allocation3 + $0x1], 1 }

</bundles_post_ra>
